<compile_context>
chip_gen: v6e
topology: v6e:2x2x1
jax: 0.10.0
libtpu: 0.0.40
codegen_flags: <defaults>
</compile_context>

<pallas_src>
import jax
import jax.numpy as jnp
from jax.experimental import pallas as pl
from jax.experimental.pallas import tpu as pltpu

LANE = 128     # vreg lane width (last-dim tiling target)
SUBLANE = 8    # vreg sublane width for 32-bit dtypes


def _round_up(x, m):
    return ((x + m - 1) // m) * m


def _sublane_multiple(dtype):
    """Second-minor tile multiple for a dtype (8 for f32, 16 for bf16, ...)."""
    bits = jnp.dtype(dtype).itemsize * 8
    return max(SUBLANE, (32 // bits) * SUBLANE)


def _generator_kernel(z_ref, w1_ref, b1_ref, w2_ref, b2_ref, w3_ref, b3_ref,
                      out_ref):
    """Fused generator MLP: z -> Linear+ReLU -> Linear+ReLU -> Linear+tanh."""
    # Layer 1: bf16 x bf16 MXU matmul, f32 accumulation; bias/ReLU in f32.
    h1 = jnp.dot(z_ref[...], w1_ref[...],
                 preferred_element_type=jnp.float32) + b1_ref[...]
    h1 = jnp.maximum(h1, 0.0)

    # Layer 2 (cast activations back to the weights' dtype for the MXU).
    h2 = jnp.dot(h1.astype(w2_ref.dtype), w2_ref[...],
                 preferred_element_type=jnp.float32) + b2_ref[...]
    h2 = jnp.maximum(h2, 0.0)

    # Output layer + tanh (coords in [-1, 1]); lane-dense (out_pad = k*128)
    # unmasked store.
    out = jnp.tanh(jnp.dot(h2.astype(w3_ref.dtype), w3_ref[...],
                           preferred_element_type=jnp.float32) + b3_ref[...])
    out_ref[...] = out.astype(out_ref.dtype)


def ligand_gan_forward(z, params, num_atoms, *, block_b=None):
    """Fused generator forward. z: (B, latent_dim) -> (B, num_atoms, 3)."""
    w1, b1, w2, b2, w3, b3 = params
    B, latent = z.shape
    if w1.shape[0] != latent:
        raise ValueError("w1 contraction dim must equal z's latent dim")
    out_pad = w3.shape[1]
    out_dim = num_atoms * 3
    if out_dim > out_pad:
        raise ValueError("w3 output dim smaller than num_atoms*3")

    if B == 0:
        return jnp.zeros((0, num_atoms, 3), w3.dtype)

    # Read z in the weights' dtype (bf16 by default) so the kernel's z DMA is
    # half-width.  Ideally the producer of z emits this dtype directly so the
    # cast fuses upstream.
    z = z.astype(w1.dtype)

    # Batch tile: multiple of the dtype's sublane tile, big enough to amortize
    # per-step overhead, capped at ceil(B/2) so big batches keep >=2 grid
    # steps for v7x's two TensorCores.  No batch padding (ragged last block).
    mult = _sublane_multiple(z.dtype)
    if block_b is None:
        block_b = max(mult, min(1024, _round_up(pl.cdiv(B, 2), mult)))
    else:
        block_b = max(mult, _round_up(block_b, mult))
    grid = (pl.cdiv(B, block_b),)

    def const_spec(a):
        # Same block index every grid step -> stays VMEM-resident (no re-DMA).
        # If hidden is ever scaled to >=2048, also pass
        # pipeline_mode=pl.Buffered(1) here so constants are not
        # double-buffered (VMEM matters on v7x's 64 MiB).
        return pl.BlockSpec(a.shape, lambda i: (0, 0))

    flat = pl.pallas_call(
        _generator_kernel,
        out_shape=jax.ShapeDtypeStruct((B, out_pad), w3.dtype),
        grid_spec=pltpu.PrefetchScalarGridSpec(
            num_scalar_prefetch=0,
            grid=grid,
            in_specs=[
                # z block: last dim == full array dim -> no lane padding, no
                # wrapper-side pad copy.
                pl.BlockSpec((block_b, latent), lambda i: (i, 0)),
                const_spec(w1), const_spec(b1),
                const_spec(w2), const_spec(b2),
                const_spec(w3), const_spec(b3),
            ],
            out_specs=pl.BlockSpec((block_b, out_pad), lambda i: (i, 0)),
        ),
        compiler_params=pltpu.CompilerParams(
            dimension_semantics=("parallel",)),
    )(z, w1, b1, w2, b2, w3, b3)

    # NOTE: this slice+reshape re-touches the (B, out_pad) output in HBM; in a
    # real pipeline fuse it into the consumer (or consume the padded layout).
    return flat[:, :out_dim].reshape(B, num_atoms, 3)


def init_params(key, latent_dim, hidden, num_atoms, *, io_dtype=jnp.bfloat16):
    """PyTorch-like scaled-normal init.

    Weight layout:
      w1: (latent_dim, hidden_pad)   -- contraction dim UNPADDED
      w2: (hidden_pad, hidden_pad)
      w3: (hidden_pad, out_pad)
    hidden/out dims are zero-padded to 128 lanes; padded rows/cols are exactly
    zero, and relu(0)=0 / tanh(0)=0 keep padded lanes inert (padded output
    lanes are sliced off in the wrapper).  Weights are stored in `io_dtype`
    (bf16 default) for halved HBM traffic / native MXU rate; biases stay f32
    because the bias add / activations run in f32 (v5e-safe).
    """
    out_dim = num_atoms * 3
    hidden_pad = _round_up(hidden, LANE)
    out_pad = _round_up(out_dim, LANE)

    k1, k2, k3 = jax.random.split(key, 3)

    def make_w(k, rows, cols, rpad, cpad, fan_in):
        w = jnp.zeros((rpad, cpad), jnp.float32)
        w = w.at[:rows, :cols].set(
            jax.random.normal(k, (rows, cols), jnp.float32)
            * (1.0 / float(fan_in) ** 0.5))
        return w.astype(io_dtype)

    w1 = make_w(k1, latent_dim, hidden, latent_dim, hidden_pad, latent_dim)
    b1 = jnp.zeros((1, hidden_pad), jnp.float32)
    w2 = make_w(k2, hidden, hidden, hidden_pad, hidden_pad, hidden)
    b2 = jnp.zeros((1, hidden_pad), jnp.float32)
    w3 = make_w(k3, hidden, out_dim, hidden_pad, out_pad, hidden)
    b3 = jnp.zeros((1, out_pad), jnp.float32)

    return (w1, b1, w2, b2, w3, b3)


if __name__ == "__main__":
    latent_dim = 32
    hidden = 64
    num_atoms = 8
    batch = 2

    key = jax.random.PRNGKey(0)
    k_params, k_z = jax.random.split(key)

    params = init_params(k_params, latent_dim, hidden, num_atoms)
    z = jax.random.normal(k_z, (batch, latent_dim), jnp.float32)

    coords = ligand_gan_forward(z, params, num_atoms)
    coords = jax.block_until_ready(coords)

    assert coords.shape == (batch, num_atoms, 3)
    coords_f32 = coords.astype(jnp.float32)
    assert bool(jnp.all(jnp.isfinite(coords_f32)))
    assert bool(jnp.all(jnp.abs(coords_f32) <= 1.0))   # tanh range
    print("KERNEL_OK")
</pallas_src>

<mosaic_0001>
module attributes {stable_mosaic.version = 11 : i64} {
  func.func @_generator_kernel(%arg0: i32, %arg1: memref<16x32xbf16, #tpu.memory_space<vmem>>, %arg2: memref<32x128xbf16, #tpu.memory_space<vmem>>, %arg3: memref<1x128xf32, #tpu.memory_space<vmem>>, %arg4: memref<128x128xbf16, #tpu.memory_space<vmem>>, %arg5: memref<1x128xf32, #tpu.memory_space<vmem>>, %arg6: memref<128x128xbf16, #tpu.memory_space<vmem>>, %arg7: memref<1x128xf32, #tpu.memory_space<vmem>>, %arg8: memref<16x128xbf16, #tpu.memory_space<vmem>>) attributes {dimension_semantics = [#tpu.dimension_semantics<parallel>], iteration_bounds = array<i64: 1>, scalar_prefetch = 0 : i64, scratch_operands = 0 : i64, tpu.core_type = #tpu.core_type<tc>, window_params = [{transform_indices = @transform_0, window_bounds = array<i64: 16, 32>}, {pipeline_mode = #tpu.pipeline_mode<synchronous>, transform_indices = @transform_1, window_bounds = array<i64: 32, 128>}, {pipeline_mode = #tpu.pipeline_mode<synchronous>, transform_indices = @transform_2, window_bounds = array<i64: 1, 128>}, {pipeline_mode = #tpu.pipeline_mode<synchronous>, transform_indices = @transform_3, window_bounds = array<i64: 128, 128>}, {pipeline_mode = #tpu.pipeline_mode<synchronous>, transform_indices = @transform_4, window_bounds = array<i64: 1, 128>}, {pipeline_mode = #tpu.pipeline_mode<synchronous>, transform_indices = @transform_5, window_bounds = array<i64: 128, 128>}, {pipeline_mode = #tpu.pipeline_mode<synchronous>, transform_indices = @transform_6, window_bounds = array<i64: 1, 128>}, {transform_indices = @transform_7, window_bounds = array<i64: 16, 128>}]} {
    %c0 = arith.constant 0 : index
    %c0_0 = arith.constant 0 : index
    %0 = vector.load %arg1[%c0, %c0_0] : memref<16x32xbf16, #tpu.memory_space<vmem>>, vector<16x32xbf16>
    %c0_1 = arith.constant 0 : index
    %c0_2 = arith.constant 0 : index
    %1 = vector.load %arg2[%c0_1, %c0_2] : memref<32x128xbf16, #tpu.memory_space<vmem>>, vector<32x128xbf16>
    %cst = arith.constant dense<0.000000e+00> : vector<16x128xf32>
    %2 = tpu.matmul %0, %1, %cst {dimension_numbers = #tpu.dot_dimension_numbers<[1], [0], [0], [1], [0, 0, 1, 1], [], []>} : vector<16x32xbf16>, vector<32x128xbf16>, vector<16x128xf32> -> vector<16x128xf32>
    %c0_3 = arith.constant 0 : index
    %c0_4 = arith.constant 0 : index
    %3 = vector.load %arg3[%c0_3, %c0_4] : memref<1x128xf32, #tpu.memory_space<vmem>>, vector<1x128xf32>
    %4 = vector.broadcast %3 : vector<1x128xf32> to vector<16x128xf32>
    %5 = arith.addf %2, %4 : vector<16x128xf32>
    %cst_5 = arith.constant 0.000000e+00 : f32
    %6 = vector.broadcast %cst_5 : f32 to vector<16x128xf32>
    %7 = arith.maximumf %5, %6 : vector<16x128xf32>
    %8 = arith.truncf %7 : vector<16x128xf32> to vector<16x128xbf16>
    %c0_6 = arith.constant 0 : index
    %c0_7 = arith.constant 0 : index
    %9 = vector.load %arg4[%c0_6, %c0_7] : memref<128x128xbf16, #tpu.memory_space<vmem>>, vector<128x128xbf16>
    %cst_8 = arith.constant dense<0.000000e+00> : vector<16x128xf32>
    %10 = tpu.matmul %8, %9, %cst_8 {dimension_numbers = #tpu.dot_dimension_numbers<[1], [0], [0], [1], [0, 0, 1, 1], [], []>} : vector<16x128xbf16>, vector<128x128xbf16>, vector<16x128xf32> -> vector<16x128xf32>
    %c0_9 = arith.constant 0 : index
    %c0_10 = arith.constant 0 : index
    %11 = vector.load %arg5[%c0_9, %c0_10] : memref<1x128xf32, #tpu.memory_space<vmem>>, vector<1x128xf32>
    %12 = vector.broadcast %11 : vector<1x128xf32> to vector<16x128xf32>
    %13 = arith.addf %10, %12 : vector<16x128xf32>
    %cst_11 = arith.constant 0.000000e+00 : f32
    %14 = vector.broadcast %cst_11 : f32 to vector<16x128xf32>
    %15 = arith.maximumf %13, %14 : vector<16x128xf32>
    %16 = arith.truncf %15 : vector<16x128xf32> to vector<16x128xbf16>
    %c0_12 = arith.constant 0 : index
    %c0_13 = arith.constant 0 : index
    %17 = vector.load %arg6[%c0_12, %c0_13] : memref<128x128xbf16, #tpu.memory_space<vmem>>, vector<128x128xbf16>
    %cst_14 = arith.constant dense<0.000000e+00> : vector<16x128xf32>
    %18 = tpu.matmul %16, %17, %cst_14 {dimension_numbers = #tpu.dot_dimension_numbers<[1], [0], [0], [1], [0, 0, 1, 1], [], []>} : vector<16x128xbf16>, vector<128x128xbf16>, vector<16x128xf32> -> vector<16x128xf32>
    %c0_15 = arith.constant 0 : index
    %c0_16 = arith.constant 0 : index
    %19 = vector.load %arg7[%c0_15, %c0_16] : memref<1x128xf32, #tpu.memory_space<vmem>>, vector<1x128xf32>
    %20 = vector.broadcast %19 : vector<1x128xf32> to vector<16x128xf32>
    %21 = arith.addf %18, %20 : vector<16x128xf32>
    %22 = math.tanh %21 : vector<16x128xf32>
    %23 = arith.truncf %22 : vector<16x128xf32> to vector<16x128xbf16>
    %c0_17 = arith.constant 0 : index
    %c0_18 = arith.constant 0 : index
    %24 = vector.load %arg8[%c0_17, %c0_18] : memref<16x128xbf16, #tpu.memory_space<vmem>>, vector<16x128xbf16>
    tpu.vector_store %arg8[%c0_17, %c0_18], %23 {strides = array<i32>} : memref<16x128xbf16, #tpu.memory_space<vmem>>, vector<16x128xbf16>,
    return
  }
  func.func @transform_0(%arg0: i32) -> (i32, i32) {
    %c0_i32 = arith.constant 0 : i32
    %c0_i32_0 = arith.constant 0 : i32
    return %arg0, %c0_i32 : i32, i32
  }
  func.func @transform_1(%arg0: i32) -> (i32, i32) {
    %c0_i32 = arith.constant 0 : i32
    %c0_i32_0 = arith.constant 0 : i32
    %c0_i32_1 = arith.constant 0 : i32
    return %c0_i32, %c0_i32_0 : i32, i32
  }
  func.func @transform_2(%arg0: i32) -> (i32, i32) {
    %c0_i32 = arith.constant 0 : i32
    %c0_i32_0 = arith.constant 0 : i32
    %c0_i32_1 = arith.constant 0 : i32
    return %c0_i32, %c0_i32_0 : i32, i32
  }
  func.func @transform_3(%arg0: i32) -> (i32, i32) {
    %c0_i32 = arith.constant 0 : i32
    %c0_i32_0 = arith.constant 0 : i32
    %c0_i32_1 = arith.constant 0 : i32
    return %c0_i32, %c0_i32_0 : i32, i32
  }
  func.func @transform_4(%arg0: i32) -> (i32, i32) {
    %c0_i32 = arith.constant 0 : i32
    %c0_i32_0 = arith.constant 0 : i32
    %c0_i32_1 = arith.constant 0 : i32
    return %c0_i32, %c0_i32_0 : i32, i32
  }
  func.func @transform_5(%arg0: i32) -> (i32, i32) {
    %c0_i32 = arith.constant 0 : i32
    %c0_i32_0 = arith.constant 0 : i32
    %c0_i32_1 = arith.constant 0 : i32
    return %c0_i32, %c0_i32_0 : i32, i32
  }
  func.func @transform_6(%arg0: i32) -> (i32, i32) {
    %c0_i32 = arith.constant 0 : i32
    %c0_i32_0 = arith.constant 0 : i32
    %c0_i32_1 = arith.constant 0 : i32
    return %c0_i32, %c0_i32_0 : i32, i32
  }
  func.func @transform_7(%arg0: i32) -> (i32, i32) {
    %c0_i32 = arith.constant 0 : i32
    %c0_i32_0 = arith.constant 0 : i32
    return %arg0, %c0_i32 : i32, i32
  }
}

</mosaic_0001>

<bundles_post_ra>
// kernel: tpu_custom_call.1
= control target key start
LH: loop header
LB: loop body
LE: loop exit
PB: predicated region body
PF: predicated region fallthrough
CT: control target
= control target key end

     0   :  { %12 = vsyncpa [#allocation3], 0  ;;  %s901_s0 = inlined_call_operand.hbm [shape: bf16[2,32], index: 0, kind: input, shape index: {}]   ;;  %s902_s1 = inlined_call_operand.hbm [shape: bf16[32,128], index: 1, kind: input, shape index: {}]   ;;  %s903_s2 = inlined_call_operand.vmem [shape: f32[1,128], index: 2, kind: input, shape index: {}]   ;;  %s904_s3 = inlined_call_operand.hbm [shape: bf16[128,128], index: 3, kind: input, shape index: {}]   ;;  %s905_s4 = inlined_call_operand.vmem [shape: f32[1,128], index: 4, kind: input, shape index: {}]   ;;  %s906_s5 = inlined_call_operand.hbm [shape: bf16[128,128], index: 5, kind: input, shape index: {}]   ;;  %s907_s6 = inlined_call_operand.vmem [shape: f32[1,128], index: 6, kind: input, shape index: {}]   ;;  %s908_s7 = inlined_call_operand.hbm [shape: bf16[2,128], index: 7, kind: output, shape index: {}]  }
   0x1   :  { %13 = vsyncpa [#allocation6], 0 }
   0x2   :  { %14 = vsyncpa [#allocation9], 0 }
   0x3   :  { %15 = vsyncpa [#allocation4], 0 }
   0x4   :  { %20 = vsyncadd [#allocation3], 112  ;;  %s772_s24 = smov [#allocation5]  }
   0x5   :  { %s33_s25 = sshll.u32 %s772_s24, 4  ;;  %s34_s25 = int_to_ptr.vmem [resolvable:$true] %s33_s25 }
   0x6   :  { %s672_s26 = scalar_lea.vmem %s34_s25, 256  ;;  %p677_p1 = scmp.lt.s32.totalorder %s34_s25, %s34_s25 }
   0x7   :  { %p673_p0 = scmp.ne.s32.totalorder %s34_s25, %s672_s26  ;;  %p678_p2 = scmp.lt.s32.totalorder %s672_s26, %s672_s26 }
   0x9   :  { %p679_p3 = por %p678_p2, %p677_p1 }
   0xb   :  { %p680_p4 = pnand %p679_p3, %p673_p0 }
   0xd   :  { %683 = shalt.err (!%p680_p4)
}
   0xe   :  { %s773_s27 = smov 64   ;;  %s774_s28 = smov 4  }
   0xf   :  { %39 = dma.hbm_to_vmem [thread:$0]  %s902_s1, 256, %s34_s25, [#allocation6], %s773_s27, %s773_s27, %s774_s28  }
  0x10   :  { %s775_s8 = smov [#allocation2]  }
  0x11   :  { %s21_s9 = sshll.u32 %s775_s8, 4  ;;  %s22_s9 = int_to_ptr.vmem [resolvable:$true] %s21_s9 }
  0x12   :  { %s692_s10 = scalar_lea.vmem %s22_s9, 16  ;;  %s696_s11 = scalar_lea.vmem %s22_s9, 128 }
  0x13   :  { %p693_p5 = scmp.ne.s32.totalorder %s22_s9, %s692_s10  ;;  %p697_p6 = scmp.lt.s32.totalorder %s22_s9, %s22_s9 }
  0x14   :  { %p698_p7 = scmp.lt.s32.totalorder %s696_s11, %s692_s10 }
  0x16   :  { %p699_p8 = por %p698_p7, %p697_p6 }
  0x18   :  { %p700_p9 = pnand %p699_p8, %p693_p5 }
  0x1a   :  { %703 = shalt.err (!%p700_p9)
}
  0x1b   :  { %s776_s12 = smov 16   ;;  %s777_s13 = smov 1  }
  0x1c   :  { %27 = dma.hbm_to_vmem [thread:$0]  %s901_s0, 16, %s22_s9, [#allocation3], %s776_s12, %s776_s12, %s777_s13  }
  0x1d   :  { %s778_s1 = smov [#allocation7]   ;;  %s779_s17 = smov [#allocation8]  }
  0x1e   :  { %s47_s16 = sshll.u32 %s778_s1, 4  ;;  %s61_s18 = sshll.u32 %s779_s17, 4  ;;  %s48_s16 = int_to_ptr.vmem [resolvable:$true] %s47_s16  ;;  %s62_s18 = int_to_ptr.vmem [resolvable:$true] %s61_s18 }
  0x1f   :  { %s712_s19 = scalar_lea.vmem %s48_s16, 1024  ;;  %p717_p11 = scmp.lt.s32.totalorder %s48_s16, %s48_s16 }
  0x20   :  { %p713_p10 = scmp.ne.s32.totalorder %s48_s16, %s712_s19  ;;  %p718_p12 = scmp.lt.s32.totalorder %s712_s19, %s712_s19 }
  0x22   :  { %p719_p13 = por %p718_p12, %p717_p11 }
  0x24   :  { %p720_p0 = pnand %p719_p13, %p713_p10 }
  0x26   :  { %723 = shalt.err (!%p720_p0)
}
  0x27   :  { %53 = dma.hbm_to_vmem [thread:$0]  %s904_s3, 1024, %s48_s16, [#allocation6], %s773_s27, %s773_s27, %s774_s28  }
  0x28   :  { %s732_s0 = scalar_lea.vmem %s62_s18, 1024  ;;  %p737_p2 = scmp.lt.s32.totalorder %s62_s18, %s62_s18 }
  0x29   :  { %p733_p1 = scmp.ne.s32.totalorder %s62_s18, %s732_s0  ;;  %p738_p3 = scmp.lt.s32.totalorder %s732_s0, %s732_s0 }
  0x2b   :  { %p739_p4 = por %p738_p3, %p737_p2 }
  0x2d   :  { %p740_p5 = pnand %p739_p4, %p733_p1 }
  0x2f   :  { %743 = shalt.err (!%p740_p5)
}
  0x30   :  { %67 = dma.hbm_to_vmem [thread:$0]  %s906_s5, 1024, %s62_s18, [#allocation9], %s773_s27, %s773_s27, %s774_s28  }
  0x31   :  { %764 = dma.done.wait [#allocation3], 128  }
  0x32   :  { %765 = vsyncadd [#allocation3], 4294967168 }
  0x33   :  { %766 = dma.done.wait [#allocation6], 1280  }
  0x34   :  { %767 = vsyncadd [#allocation6], 4294966016 }
  0x35   :  { %768 = dma.done.wait [#allocation9], 1024  }
  0x36   :  { %769 = vsyncadd [#allocation9], 4294966272  ;;  %v117_v0 = vlaneseq  ;;  %v780_v1 = vmov 0.0   ;;  %vm781_vm0 = vmmov 0   ;;  %v782_v2 = vmov 1966171168  }
  0x37   :  { %582 = vmatprep.subr.bf16.mxu0 %v780_v1  ;;  %586 = vmatprep.mubr.msk.bf16.mxu0 %vm781_vm0, %v780_v1  ;;  %v115_v3 = vunpack.c.l.s4 %v782_v2  ;;  %v642_v6 = vld [vmem:[#allocation5 + $0x8] sm:$0xff]   ;;  %v643_v7 = vld [vmem:[#allocation5] sm:$0xff]   ;;  %v83_v9 = vld [vmem:[#allocation2] sm:$0x1]  ;;  %vm171_vm1 = vcmask 261120  }
  0x38   :  { %590 = vmatprep.subr.bf16.mxu1 %v780_v1  ;;  %606 = vmatprep.mubr.msk.bf16.mxu1 %vm781_vm0, %v780_v1  ;;  %v118_v5 = vshrl.u32 %v117_v0, 7  ;;  %v84_v10 = vld [vmem:[#allocation2 + $0x1] sm:$0x1]  ;;  %v85_v11 = vld [vmem:[#allocation2 + $0x2] sm:$0x1]  ;;  %v644_v22 = vld [vmem:[#allocation7 + $0x38] sm:$0xff]  }
  0x39   :  { %v116_v4 = vunpack.c.0.s8 %v115_v3  ;;  %583 = vmatpush3.bf16.msra.mxu0 %v642_v6  ;;  %v86_v12 = vld [vmem:[#allocation2 + $0x3] sm:$0x1]  ;;  %v87_v13 = vld [vmem:[#allocation2 + $0x4] sm:$0x1]  ;;  %v88_v14 = vld [vmem:[#allocation2 + $0x5] sm:$0x1]  ;;  %v110_v15 = vcombine.low %v83_v9, %v84_v10  ;;  %591 = vmatpush3.bf16.msra.mxu1 %v644_v22 }
  0x3a   :  { %584 = vmatprep.subr.bf16.mxu0 %v780_v1  ;;  %v89_v16 = vld [vmem:[#allocation2 + $0x6] sm:$0x1]  ;;  %v90_v17 = vld [vmem:[#allocation2 + $0x7] sm:$0x1]  ;;  %v111_v18 = vcombine.low %v85_v11, %v86_v12  ;;  %v112_v19 = vcombine.low %v87_v13, %v88_v14  ;;  %v645_v26 = vld [vmem:[#allocation7 + $0x30] sm:$0xff]   ;;  %592 = vmatprep.subr.bf16.mxu1 %v780_v1 }
  0x3b   :  { %v854_v8 = vsub.s32 %v116_v4, %v118_v5  ;;  %v113_v20 = vcombine.low %v89_v16, %v90_v17  ;;  %v646_v29 = vld [vmem:[#allocation7 + $0x28] sm:$0xff]   ;;  %v647_v33 = vld [vmem:[#allocation7 + $0x20] sm:$0xff]   ;;  %v648_v34 = vld [vmem:[#allocation7 + $0x18] sm:$0xff]  }
  0x3c   :  { %v649_v35 = vld [vmem:[#allocation7 + $0x10] sm:$0xff]   ;;  %v650_v36 = vld [vmem:[#allocation7 + $0x8] sm:$0xff]   ;;  %v651_v37 = vld [vmem:[#allocation7] sm:$0xff]  }
  0x3d   :  { %v120_v21 = vrot.slane %v110_v15, %v854_v8  ;;  %585 = vmatpush3.bf16.msra.mxu0 %v643_v7  ;;  %v127_v23 = vrot.slane %v111_v18, %v854_v8  ;;  %v134_v24 = vrot.slane %v112_v19, %v854_v8  ;;  %v141_v25 = vrot.slane %v113_v20, %v854_v8  ;;  %v652_v38 = vld [vmem:[#allocation8 + $0x38] sm:$0xff]   ;;  %v653_v39 = vld [vmem:[#allocation8 + $0x30] sm:$0xff]   ;;  %v654_v40 = vld [vmem:[#allocation8 + $0x28] sm:$0xff]  }
  0x3e   :  { %610 = vmatprep.subr.bf16.mxu0 %v780_v1  ;;  %593 = vmatpush3.bf16.msra.mxu1 %v645_v26  ;;  %v655_v41 = vld [vmem:[#allocation8 + $0x20] sm:$0xff]   ;;  %v656_v42 = vld [vmem:[#allocation8 + $0x18] sm:$0xff]   ;;  %v534_v43 = vld [vmem:[%s903_s2] ss:$0 sm:$0xff] }
  0x3f   :  { %v142_v27 = vcombine.low %v120_v21, %v127_v23  ;;  %v143_v28 = vcombine.low %v134_v24, %v141_v25  ;;  %594 = vmatprep.subr.bf16.mxu1 %v780_v1  ;;  %v657_v53 = vld [vmem:[#allocation8 + $0x10] sm:$0xff]   ;;  %v658_v54 = vld [vmem:[#allocation8 + $0x8] sm:$0xff]   ;;  %v659_v55 = vld [vmem:[#allocation8] sm:$0xff]  }
  0x40   :  { %v538_v56 = vld [vmem:[%s905_s4] ss:$0 sm:$0xff] }
  0x41   :  { %v150_v30 = vrot.slane %v142_v27, %v854_v8  ;;  %v157_v31 = vrot.slane %v143_v28, %v854_v8 }
  0x42   :  { %595 = vmatpush3.bf16.msra.mxu1 %v646_v29 }
  0x43   :  { %v158_v32 = vcombine.low %v150_v30, %v157_v31  ;;  %596 = vmatprep.subr.bf16.mxu1 %v780_v1 }
  0x45   :  { %587 = vmatmul.mubr.msk.bf16.vlgmr.msra.gmra.mxu0 %vm171_vm1, %v158_v32 }
  0x46   :  { %626 = vmatprep.mubr.msk.bf16.mxu0 %vm781_vm0, %v780_v1  ;;  %597 = vmatpush3.bf16.msra.mxu1 %v647_v33 }
  0x47   :  { %598 = vmatprep.subr.bf16.mxu1 %v780_v1  ;;  %611 = vmatpush3.bf16.msra.mxu0 %v652_v38 }
  0x48   :  { %612 = vmatprep.subr.bf16.mxu0 %v780_v1 }
  0x4a   :  { %599 = vmatpush3.bf16.msra.mxu1 %v648_v34 }
  0x4b   :  { %600 = vmatprep.subr.bf16.mxu1 %v780_v1  ;;  %613 = vmatpush3.bf16.msra.mxu0 %v653_v39 }
  0x4c   :  { %614 = vmatprep.subr.bf16.mxu0 %v780_v1 }
  0x4e   :  { %601 = vmatpush3.bf16.msra.mxu1 %v649_v35 }
  0x4f   :  { %602 = vmatprep.subr.bf16.mxu1 %v780_v1  ;;  %615 = vmatpush3.bf16.msra.mxu0 %v654_v40 }
  0x50   :  { %616 = vmatprep.subr.bf16.mxu0 %v780_v1 }
  0x52   :  { %603 = vmatpush3.bf16.msra.mxu1 %v650_v36 }
  0x53   :  { %604 = vmatprep.subr.bf16.mxu1 %v780_v1  ;;  %617 = vmatpush3.bf16.msra.mxu0 %v655_v41 }
  0x54   :  { %618 = vmatprep.subr.bf16.mxu0 %v780_v1 }
  0x56   :  { %605 = vmatpush3.bf16.msra.mxu1 %v651_v37 }
  0x57   :  { %619 = vmatpush3.bf16.msra.mxu0 %v656_v42 }
  0x58   :  { %620 = vmatprep.subr.bf16.mxu0 %v780_v1 }
  0x5b   :  { %621 = vmatpush3.bf16.msra.mxu0 %v657_v53 }
  0x5c   :  { %622 = vmatprep.subr.bf16.mxu0 %v780_v1 }
  0x5f   :  { %623 = vmatpush3.bf16.msra.mxu0 %v658_v54 }
  0x60   :  { %624 = vmatprep.subr.bf16.mxu0 %v780_v1  ;;  %v547_v1 = vld [vmem:[%s907_s6] ss:$0 sm:$0xff] }
  0x63   :  { %625 = vmatpush3.bf16.msra.mxu0 %v659_v55 }
 0x105   :  { %v209_v44 = vpop.f32.mrf.mxu0 }
 0x106   :  { %v210_v46 = vadd.f32 %v534_v43, %v209_v44 }
 0x107   :  { %v588_v45 = vpop.f32.mrf.mxu0 }
 0x108   :  { %v216_v50 = vmax.f32 %v210_v46, 0.0 }
 0x109   :  { %v212_v47 = vpop.f32.mrf.mxu0 }
 0x10a   :  { %v213_v48 = vadd.f32 %v534_v43, %v212_v47 }
 0x10b   :  { %v589_v49 = vpop.f32.mrf.mxu0 }
 0x10c   :  { %v217_v51 = vmax.f32 %v213_v48, 0.0 }
 0x10e   :  { %v218_v52 = vpack.c.bf16 %v217_v51, %v216_v50 }
 0x110   :  { %607 = vmatmul.mubr.bf16.vlgmr.msra.gmra.mxu1 %v218_v52 }
 0x1d0   :  { %v324_v57 = vpop.f32.mrf.mxu1 }
 0x1d1   :  { %v325_v59 = vadd.f32 %v538_v56, %v324_v57 }
 0x1d2   :  { %v608_v58 = vpop.f32.mrf.mxu1 }
 0x1d3   :  { %v331_v63 = vmax.f32 %v325_v59, 0.0 }
 0x1d4   :  { %v327_v60 = vpop.f32.mrf.mxu1 }
 0x1d5   :  { %v328_v61 = vadd.f32 %v538_v56, %v327_v60 }
 0x1d6   :  { %v609_v62 = vpop.f32.mrf.mxu1 }
 0x1d7   :  { %v332_v0 = vmax.f32 %v328_v61, 0.0 }
 0x1d9   :  { %v333_v2 = vpack.c.bf16 %v332_v0, %v331_v63 }
 0x1db   :  { %627 = vmatmul.mubr.bf16.vlgmr.msra.gmra.mxu0 %v333_v2 }
 0x29b   :  { %v439_v3 = vpop.f32.mrf.mxu0 }
 0x29c   :  { %v440_v4 = vadd.f32 %v547_v1, %v439_v3 }
 0x29d   :  { %v628_v5 = vpop.f32.mrf.mxu0 }
 0x29e   :  { %660 = vtanh.f32 %v440_v4 }
 0x29f   :  { %v442_v6 = vpop.f32.mrf.mxu0 }
 0x2a0   :  { %v443_v7 = vadd.f32 %v547_v1, %v442_v6 }
 0x2a1   :  { %v629_v9 = vpop.f32.mrf.mxu0 }
 0x2a2   :  { %662 = vtanh.f32 %v443_v7 }
 0x2ab   :  { %v661_v10 = vpop.eup %660 }
 0x2af   :  { %v663_v11 = vpop.eup %662 }
 0x2b0   :  { %v448_v12 = vpack.c.bf16 %v663_v11, %v661_v10  ;;  %v556_v13 = vpack.c.bf16 %v663_v11, %v663_v11 }
 0x2b2   :  { %v457_v14 = vrot.slane %v448_v12, %v854_v8  ;;  %v464_v15 = vrot.slane %v556_v13, %v854_v8 }
 0x2b4   :  { %v465_v16 = vcombine.high %v457_v14, %v457_v14  ;;  %v466_v17 = vcombine.high %v464_v15, %v464_v15  ;;  %v473_v18 = vrot.slane %v457_v14, %v854_v8  ;;  %v480_v19 = vrot.slane %v464_v15, %v854_v8  ;;  %557 = vst.sshfl [vmem:[#allocation10] sm:$0x1 pattern:$0x73625140] %v457_v14 }
 0x2b5   :  { %559 = vst.sshfl [vmem:[#allocation10 + $0x4] sm:$0x1 pattern:$0x73625140] %v464_v15 }
 0x2b6   :  { %v487_v20 = vrot.slane %v465_v16, %v854_v8  ;;  %v494_v21 = vrot.slane %v466_v17, %v854_v8  ;;  %v495_v22 = vcombine.high %v473_v18, %v473_v18  ;;  %v496_v23 = vcombine.high %v480_v19, %v480_v19  ;;  %558 = vst.sshfl [vmem:[#allocation10 + $0x1] sm:$0x1 pattern:$0x73625140] %v465_v16 }
 0x2b7   :  { %560 = vst.sshfl [vmem:[#allocation10 + $0x5] sm:$0x1 pattern:$0x73625140] %v466_v17 }
 0x2b8   :  { %v497_v24 = vcombine.high %v487_v20, %v487_v20  ;;  %v498_v25 = vcombine.high %v494_v21, %v494_v21  ;;  %509 = vst [vmem:[#allocation10 + $0x2] sm:$0x1] %v495_v22  ;;  %513 = vst [vmem:[#allocation10 + $0x6] sm:$0x1] %v496_v23 }
 0x2ba   :  { %510 = vst [vmem:[#allocation10 + $0x3] sm:$0x1] %v497_v24  ;;  %514 = vst [vmem:[#allocation10 + $0x7] sm:$0x1] %v498_v25 }
 0x2bb   :  { %519 = vsyncadd [#allocation4], 112  ;;  %s783_s4 = smov [#allocation10]  }
 0x2bc   :  { %s520_s6 = sshll.u32 %s783_s4, 4  ;;  %s521_s6 = int_to_ptr.vmem [resolvable:$true] %s520_s6 }
 0x2bd   :  { %s744_s27 = scalar_lea.vmem %s521_s6, 16  ;;  %s748_s28 = scalar_lea.vmem %s521_s6, 128 }
 0x2be   :  { %p745_p6 = scmp.ne.s32.totalorder %s521_s6, %s744_s27  ;;  %p749_p7 = scmp.lt.s32.totalorder %s521_s6, %s521_s6 }
 0x2bf   :  { %p750_p8 = scmp.lt.s32.totalorder %s748_s28, %s744_s27 }
 0x2c1   :  { %p751_p9 = por %p750_p8, %p749_p7 }
 0x2c3   :  { %p752_p10 = pnand %p751_p9, %p745_p6 }
 0x2c5   :  { %755 = shalt.err (!%p752_p10)
}
 0x2c6   :  { %526 = dma.vmem_to_hbm [thread:$0]  %s521_s6, 16, %s908_s7, [#allocation4], %s776_s12, %s776_s12, %s777_s13  }
 0x2c7   :  { %770 = dma.done.wait [#allocation4], 128  }
 0x2c8   :  { %771 = vsyncadd [#allocation4], 4294967168 }
 0x2c9   :  { %530 = vsyncpa [#allocation3], 1 }
 0x2ca   :  { %531 = vsyncpa [#allocation6], 1 }
 0x2cb   :  { %532 = vsyncpa [#allocation9], 1 }
 0x2cc   :  { %533 = vsyncpa [#allocation4], 1 }

</bundles_post_ra>
